<compile_context>
chip_gen: v6e
topology: v6e:2x2x1
jax: 0.10.0
libtpu: 0.0.40
codegen_flags: <defaults>
</compile_context>

<pallas_src>
import functools

import jax
import jax.numpy as jnp
from jax.experimental import pallas as pl
from jax.experimental.pallas import tpu as pltpu

LANE = 128      # TPU vreg lane width (feature dims and N padded to this)


def _round_up(x, m):
    return ((x + m - 1) // m) * m


def _vmem_spec():
    # Full-array block resident in VMEM (no grid tiling needed at toy shapes).
    return pl.BlockSpec(memory_space=pltpu.VMEM)


# ----------------------------------------------------------------------------
# Fused multi-layer GCN kernel
# ----------------------------------------------------------------------------
def _make_fused_gcn_kernel(num_layers):
    n_total = num_layers + 1

    def kernel(a_ref, x_ref, w_ref, b_ref, mid_ref, logits_ref):
        # a_ref: (Np, Np) bf16        w_ref: (L+1, Fp, Fp) bf16
        # x_ref: (Np, Fp) bf16        b_ref: (L+1, 1, Fp)  f32
        # mid_ref: (L, Np, Fp) f32    logits_ref: (Np, Fp) f32
        a = a_ref[...]                  # resident across all layers
        h = x_ref[...]
        for l in range(n_total):        # static unroll (n_total is tiny)
            # Feature transform (MXU, f32 accumulate).
            xw = jnp.dot(h, w_ref[l], preferred_element_type=jnp.float32)
            # Neighborhood aggregation + bias.
            # NOTE: padded rows of h_pre equal the broadcast bias (A's padded
            # rows are zero); this is harmless because the wrapper slices
            # [:n, :feat] and Â's real rows have zeros in padded columns.
            h_pre = (
                jnp.dot(a, xw.astype(jnp.bfloat16),
                        preferred_element_type=jnp.float32)
                + b_ref[l]
            )
            if l < num_layers:
                mid_ref[l] = h_pre                      # pre-ReLU middle feats
                # ReLU applied in-register for the next layer (VPU under MXU
                # slack); no separate post-ReLU output is materialized.
                h = jnp.maximum(h_pre, 0.0).astype(jnp.bfloat16)
            else:
                logits_ref[...] = h_pre

    return kernel


# ----------------------------------------------------------------------------
# One-time operand packing (hoisted out of the forward call)
# ----------------------------------------------------------------------------
def pack_gcn_operands(a_norm, x, params):
    """Pads / casts / stacks all operands once.  Returns (packed, meta)."""
    n, in_dim = x.shape
    num_layers = len(params) - 1
    hidden_dim = params[0][0].shape[1]
    num_classes = params[-1][0].shape[1]

    n_p = _round_up(n, LANE)   # lane-dense Â -> full MXU passes on aggregation
    f_p = max(_round_up(d, LANE) for d in (in_dim, hidden_dim, num_classes))

    # Zero padding leaves the math on the real rows/columns unchanged.
    a_p = jnp.zeros((n_p, n_p), jnp.bfloat16).at[:n, :n].set(
        a_norm.astype(jnp.bfloat16))
    x_p = jnp.zeros((n_p, f_p), jnp.bfloat16).at[:n, :in_dim].set(
        x.astype(jnp.bfloat16))

    w_stack = jnp.zeros((num_layers + 1, f_p, f_p), jnp.bfloat16)
    b_stack = jnp.zeros((num_layers + 1, 1, f_p), jnp.float32)
    for l, (w, b) in enumerate(params):
        fi, fo = w.shape
        w_stack = w_stack.at[l, :fi, :fo].set(w.astype(jnp.bfloat16))
        b_stack = b_stack.at[l, :1, :fo].set(b.astype(jnp.float32))

    packed = (a_p, x_p, w_stack, b_stack)
    meta = dict(n=n, n_p=n_p, f_p=f_p, num_layers=num_layers,
                hidden_dim=hidden_dim, num_classes=num_classes)
    return packed, meta


# ----------------------------------------------------------------------------
# Jitted forward (single fused pallas_call)
# ----------------------------------------------------------------------------
@functools.partial(jax.jit, static_argnames=("num_layers",))
def _fused_gcn_call(a_p, x_p, w_stack, b_stack, *, num_layers):
    n_p = a_p.shape[0]
    f_p = x_p.shape[1]

    out_shape = (
        jax.ShapeDtypeStruct((num_layers, n_p, f_p), jnp.float32),  # pre-ReLU
        jax.ShapeDtypeStruct((n_p, f_p), jnp.float32),              # logits
    )

    # Advisory cost hint for the XLA scheduler.
    flops = (num_layers + 1) * (2 * n_p * f_p * f_p + 2 * n_p * n_p * f_p)
    bytes_accessed = (a_p.size * 2 + x_p.size * 2 + w_stack.size * 2
                      + b_stack.size * 4 + (num_layers + 1) * n_p * f_p * 4)

    # Explicit scoped-VMEM budget sized from the actual padded operands
    # (default is 16 MiB on v5e / 32 MiB on v6e+v7x; make scale-up predictable).
    vmem_bytes = (a_p.size * 2 + x_p.size * 2 + w_stack.size * 2
                  + b_stack.size * 4
                  + (num_layers + 1) * n_p * f_p * 4      # outputs
                  + 4 * n_p * f_p * 4)                    # live f32 intermediates
    vmem_limit = max(4 << 20, min(100 << 20, _round_up(2 * vmem_bytes, 1 << 20)))

    mid, logits = pl.pallas_call(
        _make_fused_gcn_kernel(num_layers),
        out_shape=out_shape,
        in_specs=[_vmem_spec()] * 4,
        out_specs=(_vmem_spec(), _vmem_spec()),
        compiler_params=pltpu.CompilerParams(vmem_limit_bytes=vmem_limit),
        cost_estimate=pl.CostEstimate(
            flops=flops, transcendentals=0, bytes_accessed=bytes_accessed),
    )(a_p, x_p, w_stack, b_stack)
    return mid, logits


def gcn_forward(packed, meta):
    """Matches GCN.forward: returns (logits, middle_feats)."""
    mid, logits = _fused_gcn_call(*packed, num_layers=meta["num_layers"])
    n, hd, nc = meta["n"], meta["hidden_dim"], meta["num_classes"]
    middle_feats = [mid[l, :n, :hd] for l in range(meta["num_layers"])]
    return logits[:n, :nc], middle_feats


# ----------------------------------------------------------------------------
# Parameter init + graph construction (mirrors the PyTorch module setup)
# ----------------------------------------------------------------------------
def init_gcn_params(key, num_layers, in_dim, hidden_dim, num_classes):
    """Deterministic Glorot-uniform init for num_layers+1 GraphConv layers."""
    dims = [in_dim] + [hidden_dim] * num_layers + [num_classes]
    params = []
    for i in range(num_layers + 1):
        fan_in, fan_out = dims[i], dims[i + 1]
        k = jax.random.fold_in(key, i)
        limit = (6.0 / (fan_in + fan_out)) ** 0.5
        w = jax.random.uniform(
            k, (fan_in, fan_out), dtype=jnp.float32, minval=-limit, maxval=limit
        )
        b = jnp.zeros((1, fan_out), dtype=jnp.float32)
        params.append((w, b))
    return params


def build_normalized_adjacency(key, n_nodes, edge_prob=0.3):
    """Dense symmetric random graph with self-loops, symmetric normalization."""
    a = (jax.random.uniform(key, (n_nodes, n_nodes)) < edge_prob).astype(jnp.float32)
    a = jnp.maximum(a, a.T)                                    # symmetrize
    a = jnp.maximum(a, jnp.eye(n_nodes, dtype=jnp.float32))    # self-loops
    deg = jnp.sum(a, axis=1)
    d_inv_sqrt = 1.0 / jnp.sqrt(deg)
    a_norm = a * d_inv_sqrt[:, None] * d_inv_sqrt[None, :]
    return a_norm.astype(jnp.float32)


# ----------------------------------------------------------------------------
# Main
# ----------------------------------------------------------------------------
if __name__ == "__main__":
    key = jax.random.PRNGKey(0)
    k_graph, k_feat, k_param = jax.random.split(key, 3)

    # Small, module-consistent shapes.
    num_layers = 2
    n_nodes = 16
    in_dim = 8
    hidden_dim = 32
    num_classes = 4

    a_norm = build_normalized_adjacency(k_graph, n_nodes)
    x = jax.random.normal(k_feat, (n_nodes, in_dim), dtype=jnp.float32)
    params = init_gcn_params(k_param, num_layers, in_dim, hidden_dim, num_classes)

    # One-time pack (padding + bf16 cast + stacking) done OUTSIDE the forward.
    packed, meta = pack_gcn_operands(a_norm, x, params)
    packed = jax.block_until_ready(packed)

    # TODO(synk): nn.Dropout(p=0) is the identity; a non-zero dropout would need
    # pltpu.prng_seed / pltpu.prng_random_bits masking inside the kernel.
    logits, middle_feats = gcn_forward(packed, meta)
    logits = jax.block_until_ready(logits)
    for mf in middle_feats:
        jax.block_until_ready(mf)

    # Sanity: shapes must match the PyTorch module's semantics.
    assert logits.shape == (n_nodes, num_classes)
    assert len(middle_feats) == num_layers
    assert all(mf.shape == (n_nodes, hidden_dim) for mf in middle_feats)

    # Cross-check against a pure-JAX reference of the same bf16 mixed-precision
    # math (bf16 operands, f32 accumulation).
    # TODO(synk): for tighter parity with the f32 PyTorch module keep Â in f32
    # (or skip the xw->bf16 cast); at these shapes the kernel is launch-bound
    # so the bf16 path is kept for the scale-up story.
    def bf(v):
        return v.astype(jnp.bfloat16).astype(jnp.float32)

    a_ref = bf(a_norm)
    h_ref = bf(x)
    for l in range(num_layers):
        w, b = params[l]
        xw = h_ref @ bf(w)
        h_pre = a_ref @ bf(xw) + b
        assert jnp.allclose(h_pre, middle_feats[l], atol=1e-2, rtol=1e-2), l
        h_ref = bf(jnp.maximum(h_pre, 0.0))
    w, b = params[-1]
    logits_ref = a_ref @ bf(h_ref @ bf(w)) + b
    assert jnp.allclose(logits_ref, logits, atol=1e-2, rtol=1e-2)

    print("KERNEL_OK")
</pallas_src>

<mosaic_0001>
module attributes {stable_mosaic.version = 11 : i64} {
  func.func @kernel(%arg0: memref<128x128xbf16, #tpu.memory_space<vmem>>, %arg1: memref<128x128xbf16, #tpu.memory_space<vmem>>, %arg2: memref<3x128x128xbf16, #tpu.memory_space<vmem>>, %arg3: memref<3x1x128xf32, #tpu.memory_space<vmem>>, %arg4: memref<2x128x128xf32, #tpu.memory_space<vmem>>, %arg5: memref<128x128xf32, #tpu.memory_space<vmem>>) attributes {dimension_semantics = [], scalar_prefetch = 0 : i64, scratch_operands = 0 : i64, tpu.core_type = #tpu.core_type<tc>} {
    %c0 = arith.constant 0 : index
    %c0_0 = arith.constant 0 : index
    %0 = vector.load %arg0[%c0, %c0_0] : memref<128x128xbf16, #tpu.memory_space<vmem>>, vector<128x128xbf16>
    %c0_1 = arith.constant 0 : index
    %c0_2 = arith.constant 0 : index
    %1 = vector.load %arg1[%c0_1, %c0_2] : memref<128x128xbf16, #tpu.memory_space<vmem>>, vector<128x128xbf16>
    %c0_3 = arith.constant 0 : index
    %c0_4 = arith.constant 0 : index
    %c0_5 = arith.constant 0 : index
    %2 = vector.load %arg2[%c0_3, %c0_4, %c0_5] : memref<3x128x128xbf16, #tpu.memory_space<vmem>>, vector<1x128x128xbf16>
    %3 = vector.shape_cast %2 : vector<1x128x128xbf16> to vector<128x128xbf16>
    %cst = arith.constant dense<0.000000e+00> : vector<128x128xf32>
    %4 = tpu.matmul %1, %3, %cst {dimension_numbers = #tpu.dot_dimension_numbers<[1], [0], [0], [1], [0, 0, 1, 1], [], []>} : vector<128x128xbf16>, vector<128x128xbf16>, vector<128x128xf32> -> vector<128x128xf32>
    %5 = arith.truncf %4 : vector<128x128xf32> to vector<128x128xbf16>
    %cst_6 = arith.constant dense<0.000000e+00> : vector<128x128xf32>
    %6 = tpu.matmul %0, %5, %cst_6 {dimension_numbers = #tpu.dot_dimension_numbers<[1], [0], [0], [1], [0, 0, 1, 1], [], []>} : vector<128x128xbf16>, vector<128x128xbf16>, vector<128x128xf32> -> vector<128x128xf32>
    %c0_7 = arith.constant 0 : index
    %c0_8 = arith.constant 0 : index
    %c0_9 = arith.constant 0 : index
    %7 = vector.load %arg3[%c0_7, %c0_8, %c0_9] : memref<3x1x128xf32, #tpu.memory_space<vmem>>, vector<1x1x128xf32>
    %8 = vector.shape_cast %7 : vector<1x1x128xf32> to vector<1x128xf32>
    %9 = vector.broadcast %8 : vector<1x128xf32> to vector<128x128xf32>
    %10 = arith.addf %6, %9 : vector<128x128xf32>
    %c0_10 = arith.constant 0 : index
    %c0_11 = arith.constant 0 : index
    %c0_12 = arith.constant 0 : index
    %11 = vector.load %arg4[%c0_10, %c0_11, %c0_12] : memref<2x128x128xf32, #tpu.memory_space<vmem>>, vector<1x128x128xf32>
    %12 = vector.shape_cast %11 : vector<1x128x128xf32> to vector<128x128xf32>
    %13 = vector.shape_cast %10 : vector<128x128xf32> to vector<1x128x128xf32>
    tpu.vector_store %arg4[%c0_10, %c0_11, %c0_12], %13 {strides = array<i32>} : memref<2x128x128xf32, #tpu.memory_space<vmem>>, vector<1x128x128xf32>,
    %cst_13 = arith.constant 0.000000e+00 : f32
    %14 = vector.broadcast %cst_13 : f32 to vector<128x128xf32>
    %15 = arith.maximumf %10, %14 : vector<128x128xf32>
    %16 = arith.truncf %15 : vector<128x128xf32> to vector<128x128xbf16>
    %c1 = arith.constant 1 : index
    %c0_14 = arith.constant 0 : index
    %c0_15 = arith.constant 0 : index
    %17 = vector.load %arg2[%c1, %c0_14, %c0_15] : memref<3x128x128xbf16, #tpu.memory_space<vmem>>, vector<1x128x128xbf16>
    %18 = vector.shape_cast %17 : vector<1x128x128xbf16> to vector<128x128xbf16>
    %cst_16 = arith.constant dense<0.000000e+00> : vector<128x128xf32>
    %19 = tpu.matmul %16, %18, %cst_16 {dimension_numbers = #tpu.dot_dimension_numbers<[1], [0], [0], [1], [0, 0, 1, 1], [], []>} : vector<128x128xbf16>, vector<128x128xbf16>, vector<128x128xf32> -> vector<128x128xf32>
    %20 = arith.truncf %19 : vector<128x128xf32> to vector<128x128xbf16>
    %cst_17 = arith.constant dense<0.000000e+00> : vector<128x128xf32>
    %21 = tpu.matmul %0, %20, %cst_17 {dimension_numbers = #tpu.dot_dimension_numbers<[1], [0], [0], [1], [0, 0, 1, 1], [], []>} : vector<128x128xbf16>, vector<128x128xbf16>, vector<128x128xf32> -> vector<128x128xf32>
    %c1_18 = arith.constant 1 : index
    %c0_19 = arith.constant 0 : index
    %c0_20 = arith.constant 0 : index
    %22 = vector.load %arg3[%c1_18, %c0_19, %c0_20] : memref<3x1x128xf32, #tpu.memory_space<vmem>>, vector<1x1x128xf32>
    %23 = vector.shape_cast %22 : vector<1x1x128xf32> to vector<1x128xf32>
    %24 = vector.broadcast %23 : vector<1x128xf32> to vector<128x128xf32>
    %25 = arith.addf %21, %24 : vector<128x128xf32>
    %c1_21 = arith.constant 1 : index
    %c0_22 = arith.constant 0 : index
    %c0_23 = arith.constant 0 : index
    %26 = vector.load %arg4[%c1_21, %c0_22, %c0_23] : memref<2x128x128xf32, #tpu.memory_space<vmem>>, vector<1x128x128xf32>
    %27 = vector.shape_cast %26 : vector<1x128x128xf32> to vector<128x128xf32>
    %28 = vector.shape_cast %25 : vector<128x128xf32> to vector<1x128x128xf32>
    tpu.vector_store %arg4[%c1_21, %c0_22, %c0_23], %28 {strides = array<i32>} : memref<2x128x128xf32, #tpu.memory_space<vmem>>, vector<1x128x128xf32>,
    %cst_24 = arith.constant 0.000000e+00 : f32
    %29 = vector.broadcast %cst_24 : f32 to vector<128x128xf32>
    %30 = arith.maximumf %25, %29 : vector<128x128xf32>
    %31 = arith.truncf %30 : vector<128x128xf32> to vector<128x128xbf16>
    %c2 = arith.constant 2 : index
    %c0_25 = arith.constant 0 : index
    %c0_26 = arith.constant 0 : index
    %32 = vector.load %arg2[%c2, %c0_25, %c0_26] : memref<3x128x128xbf16, #tpu.memory_space<vmem>>, vector<1x128x128xbf16>
    %33 = vector.shape_cast %32 : vector<1x128x128xbf16> to vector<128x128xbf16>
    %cst_27 = arith.constant dense<0.000000e+00> : vector<128x128xf32>
    %34 = tpu.matmul %31, %33, %cst_27 {dimension_numbers = #tpu.dot_dimension_numbers<[1], [0], [0], [1], [0, 0, 1, 1], [], []>} : vector<128x128xbf16>, vector<128x128xbf16>, vector<128x128xf32> -> vector<128x128xf32>
    %35 = arith.truncf %34 : vector<128x128xf32> to vector<128x128xbf16>
    %cst_28 = arith.constant dense<0.000000e+00> : vector<128x128xf32>
    %36 = tpu.matmul %0, %35, %cst_28 {dimension_numbers = #tpu.dot_dimension_numbers<[1], [0], [0], [1], [0, 0, 1, 1], [], []>} : vector<128x128xbf16>, vector<128x128xbf16>, vector<128x128xf32> -> vector<128x128xf32>
    %c2_29 = arith.constant 2 : index
    %c0_30 = arith.constant 0 : index
    %c0_31 = arith.constant 0 : index
    %37 = vector.load %arg3[%c2_29, %c0_30, %c0_31] : memref<3x1x128xf32, #tpu.memory_space<vmem>>, vector<1x1x128xf32>
    %38 = vector.shape_cast %37 : vector<1x1x128xf32> to vector<1x128xf32>
    %39 = vector.broadcast %38 : vector<1x128xf32> to vector<128x128xf32>
    %40 = arith.addf %36, %39 : vector<128x128xf32>
    %c0_32 = arith.constant 0 : index
    %c0_33 = arith.constant 0 : index
    %41 = vector.load %arg5[%c0_32, %c0_33] : memref<128x128xf32, #tpu.memory_space<vmem>>, vector<128x128xf32>
    tpu.vector_store %arg5[%c0_32, %c0_33], %40 {strides = array<i32>} : memref<128x128xf32, #tpu.memory_space<vmem>>, vector<128x128xf32>,
    return
  }
}

</mosaic_0001>

<bundles_post_ra>
// kernel: _fused_gcn_call.1
= control target key start
LH: loop header
LB: loop body
LE: loop exit
PB: predicated region body
PF: predicated region fallthrough
CT: control target
= control target key end

     0   :  { %11 = vsyncpa [#allocation3], 0  ;;  %s1780_s0 = inlined_call_operand.hbm [shape: bf16[128,128], index: 0, kind: input, shape index: {}]   ;;  %s1781_s1 = inlined_call_operand.hbm [shape: bf16[128,128], index: 1, kind: input, shape index: {}]   ;;  %s1782_s2 = inlined_call_operand.hbm [shape: bf16[3,128,128], index: 2, kind: input, shape index: {}]   ;;  %s1783_s3 = inlined_call_operand.vmem [shape: f32[3,1,128], index: 3, kind: input, shape index: {}]   ;;  %s1784_s4 = inlined_call_operand.hbm [shape: f32[2,128,128], index: 4, kind: output, shape index: {0}]   ;;  %s1785_s5 = inlined_call_operand.hbm [shape: f32[128,128], index: 5, kind: output, shape index: {1}]  }
   0x1   :  { %12 = vsyncpa [#allocation6], 0 }
   0x2   :  { %13 = vsyncpa [#allocation4], 0 }
   0x3   :  { %14 = vsyncpa [#allocation10], 0  ;;  %s1635_s18 = smov [#allocation5]   ;;  %s1636_s20 = smov [#allocation2]  }
   0x4   :  { %s32_s19 = sshll.u32 %s1635_s18, 4  ;;  %s20_s21 = sshll.u32 %s1636_s20, 4  ;;  %s33_s19 = int_to_ptr.vmem [resolvable:$true] %s32_s19  ;;  %s21_s21 = int_to_ptr.vmem [resolvable:$true] %s20_s21 }
   0x5   :  { %s1535_s22 = scalar_lea.vmem %s33_s19, 1024  ;;  %p1540_p1 = scmp.lt.s32.totalorder %s33_s19, %s33_s19 }
   0x6   :  { %p1536_p0 = scmp.ne.s32.totalorder %s33_s19, %s1535_s22  ;;  %p1541_p2 = scmp.lt.s32.totalorder %s1535_s22, %s1535_s22 }
   0x8   :  { %p1542_p3 = por %p1541_p2, %p1540_p1 }
   0xa   :  { %p1543_p4 = pnand %p1542_p3, %p1536_p0 }
   0xc   :  { %1546 = shalt.err (!%p1543_p4)
}
   0xd   :  { %s1637_s23 = smov 64   ;;  %s1638_s24 = smov 4  }
   0xe   :  { %38 = dma.hbm_to_vmem [thread:$0]  %s1781_s1, 1024, %s33_s19, [#allocation6], %s1637_s23, %s1637_s23, %s1638_s24  }
   0xf   :  { %s1555_s27 = scalar_lea.vmem %s21_s21, 1024  ;;  %p1560_p6 = scmp.lt.s32.totalorder %s21_s21, %s21_s21 }
  0x10   :  { %p1556_p5 = scmp.ne.s32.totalorder %s21_s21, %s1555_s27  ;;  %p1561_p7 = scmp.lt.s32.totalorder %s1555_s27, %s1555_s27 }
  0x12   :  { %p1562_p8 = por %p1561_p7, %p1560_p6 }
  0x14   :  { %p1563_p9 = pnand %p1562_p8, %p1556_p5 }
  0x16   :  { %1566 = shalt.err (!%p1563_p9)
}
  0x17   :  { %26 = dma.hbm_to_vmem [thread:$0]  %s1780_s0, 1024, %s21_s21, [#allocation3], %s1637_s23, %s1637_s23, %s1638_s24  }
  0x18   :  { %s1639_s30 = smov [#allocation7]  }
  0x19   :  { %s44_s6 = sshll.u32 %s1639_s30, 4  ;;  %s45_s6 = int_to_ptr.vmem [resolvable:$true] %s44_s6 }
  0x1a   :  { %s1575_s7 = scalar_lea.vmem %s45_s6, 3072  ;;  %p1580_p11 = scmp.lt.s32.totalorder %s45_s6, %s45_s6 }
  0x1b   :  { %p1576_p10 = scmp.ne.s32.totalorder %s45_s6, %s1575_s7  ;;  %p1581_p12 = scmp.lt.s32.totalorder %s1575_s7, %s1575_s7 }
  0x1d   :  { %p1582_p13 = por %p1581_p12, %p1580_p11 }
  0x1f   :  { %p1583_p0 = pnand %p1582_p13, %p1576_p10 }
  0x21   :  { %1586 = shalt.err (!%p1583_p0)
}
  0x22   :  { %50 = dma.hbm_to_vmem [thread:$0]  %s1782_s2, 3072, %s45_s6, [#allocation6], %s1637_s23, %s1637_s23, %s1638_s24  }
  0x23   :  { %1627 = dma.done.wait [#allocation3], 1024  }
  0x24   :  { %1628 = vsyncadd [#allocation3], 4294966272 }
  0x25   :  { %1629 = dma.done.wait [#allocation6], 4096  }
  0x26   :  { %1630 = vsyncadd [#allocation6], 4294963200  ;;  %v1487_v0 = vld [vmem:[#allocation7 + $0x38] sm:$0xff]   ;;  %v1488_v1 = vld [vmem:[#allocation7 + $0x30] sm:$0xff]   ;;  %s1640_s11 = smov [#allocation8]  }
  0x27   :  { %1286 = vmatprep.subr.bf16.mxu0 %v1487_v0  ;;  %v1489_v2 = vld [vmem:[#allocation7 + $0x28] sm:$0xff]   ;;  %v1490_v3 = vld [vmem:[#allocation7 + $0x20] sm:$0xff]   ;;  %v1491_v5 = vld [vmem:[#allocation7 + $0x18] sm:$0xff]   ;;  %s1116_s12 = sshll.u32 %s1640_s11, 4  ;;  %s1117_s12 = int_to_ptr.vmem [resolvable:$true] %s1116_s12 }
  0x28   :  { %1287 = vmatpush3.bf16.msra.mxu0 %v1487_v0  ;;  %v1495_v4 = vld [vmem:[#allocation5] sm:$0xff]   ;;  %v1492_v6 = vld [vmem:[#allocation7 + $0x10] sm:$0xff]   ;;  %v1493_v7 = vld [vmem:[#allocation7 + $0x8] sm:$0xff]   ;;  %s1587_s13 = scalar_lea.vmem %s1117_s12, 4096  ;;  %p1592_p2 = scmp.lt.s32.totalorder %s1117_s12, %s1117_s12 }
  0x29   :  { %1288 = vmatprep.subr.bf16.mxu0 %v1488_v1  ;;  %1302 = vmatprep.mubr.bf16.mxu0 %v1495_v4  ;;  %v1494_v8 = vld [vmem:[#allocation7] sm:$0xff]   ;;  %v1496_v9 = vld [vmem:[#allocation5 + $0x8] sm:$0xff]   ;;  %v1497_v10 = vld [vmem:[#allocation5 + $0x10] sm:$0xff]   ;;  %p1588_p1 = scmp.ne.s32.totalorder %s1117_s12, %s1587_s13  ;;  %p1593_p3 = scmp.lt.s32.totalorder %s1587_s13, %s1587_s13 }
  0x2a   :  { %v1498_v11 = vld [vmem:[#allocation5 + $0x18] sm:$0xff]   ;;  %v1499_v12 = vld [vmem:[#allocation5 + $0x20] sm:$0xff]   ;;  %v1500_v13 = vld [vmem:[#allocation5 + $0x28] sm:$0xff]  }
  0x2b   :  { %v1501_v14 = vld [vmem:[#allocation5 + $0x30] sm:$0xff]   ;;  %v1502_v15 = vld [vmem:[#allocation5 + $0x38] sm:$0xff]   ;;  %v1683_v16 = vld [vmem:[#allocation2] sm:$0xff]   ;;  %p1594_p4 = por %p1593_p3, %p1592_p2 }
  0x2c   :  { %1289 = vmatpush3.bf16.msra.mxu0 %v1488_v1  ;;  %1334 = vmatprep.mubr.bf16.mxu1 %v1683_v16  ;;  %v1511_v17 = vld [vmem:[#allocation7 + $0x78] sm:$0xff]   ;;  %v1512_v18 = vld [vmem:[#allocation7 + $0x70] sm:$0xff]   ;;  %v1513_v19 = vld [vmem:[#allocation7 + $0x68] sm:$0xff]  }
  0x2d   :  { %1290 = vmatprep.subr.bf16.mxu0 %v1489_v2  ;;  %v1514_v20 = vld [vmem:[#allocation7 + $0x60] sm:$0xff]   ;;  %v1515_v21 = vld [vmem:[#allocation7 + $0x58] sm:$0xff]   ;;  %v1686_v46 = vld [vmem:[#allocation2 + $0x8] sm:$0xff]   ;;  %p1595_p5 = pnand %p1594_p4, %p1588_p1 }
  0x2e   :  { %v1688_v47 = vld [vmem:[#allocation2 + $0x10] sm:$0xff]   ;;  %v1692_v48 = vld [vmem:[#allocation2 + $0x18] sm:$0xff]   ;;  %v1694_v49 = vld [vmem:[#allocation2 + $0x20] sm:$0xff]  }
  0x2f   :  { %v1698_v50 = vld [vmem:[#allocation2 + $0x28] sm:$0xff]   ;;  %v1700_v51 = vld [vmem:[#allocation2 + $0x30] sm:$0xff]   ;;  %v1704_v52 = vld [vmem:[#allocation2 + $0x38] sm:$0xff]  }
  0x30   :  { %1291 = vmatpush3.bf16.msra.mxu0 %v1489_v2  ;;  %v1516_v53 = vld [vmem:[#allocation7 + $0x50] sm:$0xff]   ;;  %v1517_v54 = vld [vmem:[#allocation7 + $0x48] sm:$0xff]   ;;  %v1518_v55 = vld [vmem:[#allocation7 + $0x40] sm:$0xff]  }
  0x31   :  { %1292 = vmatprep.subr.bf16.mxu0 %v1490_v3  ;;  %v1711_v56 = vld [vmem:[%s1783_s3] ss:$0 sm:$0xff] }
  0x34   :  { %1293 = vmatpush3.bf16.msra.mxu0 %v1490_v3 }
  0x35   :  { %1294 = vmatprep.subr.bf16.mxu0 %v1491_v5 }
  0x38   :  { %1295 = vmatpush3.bf16.msra.mxu0 %v1491_v5 }
  0x39   :  { %1296 = vmatprep.subr.bf16.mxu0 %v1492_v6 }
  0x3c   :  { %1297 = vmatpush3.bf16.msra.mxu0 %v1492_v6 }
  0x3d   :  { %1298 = vmatprep.subr.bf16.mxu0 %v1493_v7 }
  0x40   :  { %1299 = vmatpush3.bf16.msra.mxu0 %v1493_v7 }
  0x41   :  { %1300 = vmatprep.subr.bf16.mxu0 %v1494_v8 }
  0x44   :  { %1301 = vmatpush3.bf16.msra.mxu0 %v1494_v8 }
  0x45   :  { %1350 = vmatprep.subr.bf16.mxu0 %v1511_v17 }
  0x47   :  { %1303 = vmatmul.mubr.bf16.vlgmr.msra.gmra.mxu0 %v1496_v9 }
  0x48   :  { %1306 = vmatprep.mubr.bf16.mxu0 %v1497_v10  ;;  %1351 = vmatpush3.bf16.msra.mxu0 %v1511_v17 }
  0x49   :  { %1352 = vmatprep.subr.bf16.mxu0 %v1512_v18 }
  0x4c   :  { %1353 = vmatpush3.bf16.msra.mxu0 %v1512_v18 }
  0x4d   :  { %1354 = vmatprep.subr.bf16.mxu0 %v1513_v19 }
  0x4f   :  { %1307 = vmatmul.mubr.bf16.gmra.mxu0 %v1498_v11 }
  0x50   :  { %1310 = vmatprep.mubr.bf16.mxu0 %v1499_v12  ;;  %1355 = vmatpush3.bf16.msra.mxu0 %v1513_v19 }
  0x51   :  { %1356 = vmatprep.subr.bf16.mxu0 %v1514_v20 }
  0x54   :  { %1357 = vmatpush3.bf16.msra.mxu0 %v1514_v20 }
  0x55   :  { %1358 = vmatprep.subr.bf16.mxu0 %v1515_v21 }
  0x57   :  { %1311 = vmatmul.mubr.bf16.gmra.mxu0 %v1500_v13 }
  0x58   :  { %1314 = vmatprep.mubr.bf16.mxu0 %v1501_v14  ;;  %1359 = vmatpush3.bf16.msra.mxu0 %v1515_v21 }
  0x59   :  { %1360 = vmatprep.subr.bf16.mxu0 %v1516_v53 }
  0x5c   :  { %1361 = vmatpush3.bf16.msra.mxu0 %v1516_v53 }
  0x5d   :  { %1362 = vmatprep.subr.bf16.mxu0 %v1517_v54 }
  0x5f   :  { %1315 = vmatmul.mubr.bf16.gmra.mxu0 %v1502_v15 }
  0x60   :  { %1363 = vmatpush3.bf16.msra.mxu0 %v1517_v54 }
  0x61   :  { %1364 = vmatprep.subr.bf16.mxu0 %v1518_v55 }
  0x64   :  { %1365 = vmatpush3.bf16.msra.mxu0 %v1518_v55 }
 0x107   :  { %v1304_v22 = vpop.f32.mrf.mxu0 }
 0x109   :  { %v241_v23 = vpop.f32.mrf.mxu0 }
 0x10b   :  { %v1305_v24 = vpop.f32.mrf.mxu0 }
 0x10c   :  { %v305_v44 = vpack.c.bf16 %v1305_v24, %v1304_v22 }
 0x10d   :  { %v244_v25 = vpop.f32.mrf.mxu0 }
 0x10e   :  { %v304_v45 = vpack.c.bf16 %v244_v25, %v241_v23 }
 0x10f   :  { %v1308_v26 = vpop.f32.mrf.mxu0 }
 0x111   :  { %v257_v27 = vpop.f32.mrf.mxu0 }
 0x113   :  { %v1309_v28 = vpop.f32.mrf.mxu0 }
 0x114   :  { %v307_v42 = vpack.c.bf16 %v1309_v28, %v1308_v26 }
 0x115   :  { %v260_v29 = vpop.f32.mrf.mxu0 }
 0x116   :  { %v306_v43 = vpack.c.bf16 %v260_v29, %v257_v27 }
 0x117   :  { %v1312_v30 = vpop.f32.mrf.mxu0 }
 0x119   :  { %v273_v31 = vpop.f32.mrf.mxu0 }
 0x11b   :  { %v1313_v32 = vpop.f32.mrf.mxu0 }
 0x11c   :  { %v309_v40 = vpack.c.bf16 %v1313_v32, %v1312_v30 }
 0x11d   :  { %v276_v33 = vpop.f32.mrf.mxu0 }
 0x11e   :  { %v308_v41 = vpack.c.bf16 %v276_v33, %v273_v31 }
 0x11f   :  { %v1316_v34 = vpop.f32.mrf.mxu0 }
 0x121   :  { %v289_v35 = vpop.f32.mrf.mxu0 }
 0x123   :  { %v1317_v36 = vpop.f32.mrf.mxu0 }
 0x124   :  { %v311_v37 = vpack.c.bf16 %v1317_v36, %v1316_v34 }
 0x125   :  { %v292_v38 = vpop.f32.mrf.mxu0 }
 0x126   :  { %v310_v39 = vpack.c.bf16 %v292_v38, %v289_v35  ;;  %1318 = vmatprep.subr.bf16.mxu1 %v311_v37 }
 0x127   :  { %1319 = vmatpush3.bf16.msra.mxu1 %v311_v37 }
 0x128   :  { %1320 = vmatprep.subr.bf16.mxu1 %v310_v39 }
 0x12b   :  { %1321 = vmatpush3.bf16.msra.mxu1 %v310_v39 }
 0x12c   :  { %1322 = vmatprep.subr.bf16.mxu1 %v309_v40 }
 0x12f   :  { %1323 = vmatpush3.bf16.msra.mxu1 %v309_v40 }
 0x130   :  { %1324 = vmatprep.subr.bf16.mxu1 %v308_v41 }
 0x133   :  { %1325 = vmatpush3.bf16.msra.mxu1 %v308_v41 }
 0x134   :  { %1326 = vmatprep.subr.bf16.mxu1 %v307_v42 }
 0x137   :  { %1327 = vmatpush3.bf16.msra.mxu1 %v307_v42 }
 0x138   :  { %1328 = vmatprep.subr.bf16.mxu1 %v306_v43 }
 0x13b   :  { %1329 = vmatpush3.bf16.msra.mxu1 %v306_v43 }
 0x13c   :  { %1330 = vmatprep.subr.bf16.mxu1 %v305_v44 }
 0x13f   :  { %1331 = vmatpush3.bf16.msra.mxu1 %v305_v44 }
 0x140   :  { %1332 = vmatprep.subr.bf16.mxu1 %v304_v45 }
 0x143   :  { %1333 = vmatpush3.bf16.msra.mxu1 %v304_v45 }
 0x146   :  { %1335 = vmatmul.mubr.bf16.vlgmr.msra.gmra.mxu1 %v1686_v46 }
 0x147   :  { %1338 = vmatprep.mubr.bf16.mxu1 %v1688_v47 }
 0x14e   :  { %1339 = vmatmul.mubr.bf16.gmra.mxu1 %v1692_v48 }
 0x14f   :  { %1342 = vmatprep.mubr.bf16.mxu1 %v1694_v49 }
 0x156   :  { %1343 = vmatmul.mubr.bf16.gmra.mxu1 %v1698_v50 }
 0x157   :  { %1346 = vmatprep.mubr.bf16.mxu1 %v1700_v51 }
 0x15e   :  { %1347 = vmatmul.mubr.bf16.gmra.mxu1 %v1704_v52 }
 0x15f   :  { %1398 = vmatprep.mubr.bf16.mxu1 %v1683_v16 }
 0x206   :  { %v1336_v57 = vpop.f32.mrf.mxu1 }
 0x207   :  { %v410_v58 = vadd.f32 %v1336_v57, %v1711_v56 }
 0x208   :  { %v401_v59 = vpop.f32.mrf.mxu1 }
 0x209   :  { %466 = vst [vmem:[#allocation8 + $0x10] sm:$0xff] %v410_v58  ;;  %v402_v60 = vadd.f32 %v1711_v56, %v401_v59  ;;  %v482_v6 = vmax.f32 %v410_v58, 0.0  ;;  %v1519_v58 = vld [vmem:[#allocation7 + $0xb8] sm:$0xff]   ;;  %v1520_v59 = vld [vmem:[#allocation7 + $0xb0] sm:$0xff]  }
 0x20a   :  { %v1337_v61 = vpop.f32.mrf.mxu1  ;;  %1414 = vmatprep.subr.bf16.mxu0 %v1519_v58 }
 0x20b   :  { %464 = vst [vmem:[#allocation8] sm:$0xff] %v402_v60  ;;  %v413_v62 = vadd.f32 %v1337_v61, %v1711_v56  ;;  %v480_v3 = vmax.f32 %v402_v60, 0.0  ;;  %v1521_v60 = vld [vmem:[#allocation7 + $0xa8] sm:$0xff]   ;;  %v1522_v61 = vld [vmem:[#allocation7 + $0xa0] sm:$0xff]  }
 0x20c   :  { %v404_v63 = vpop.f32.mrf.mxu1 }
 0x20d   :  { %467 = vst [vmem:[#allocation8 + $0x18] sm:$0xff] %v413_v62  ;;  %v405_v0 = vadd.f32 %v1711_v56, %v404_v63  ;;  %v483_v1 = vmax.f32 %v413_v62, 0.0 }
 0x20e   :  { %v1340_v2 = vpop.f32.mrf.mxu1 }
 0x20f   :  { %465 = vst [vmem:[#allocation8 + $0x8] sm:$0xff] %v405_v0  ;;  %v481_v4 = vmax.f32 %v405_v0, 0.0  ;;  %v426_v5 = vadd.f32 %v1340_v2, %v1711_v56  ;;  %v497_v10 = vpack.c.bf16 %v483_v1, %v482_v6 }
 0x210   :  { %v417_v7 = vpop.f32.mrf.mxu1 }
 0x211   :  { %470 = vst [vmem:[#allocation8 + $0x30] sm:$0xff] %v426_v5  ;;  %v418_v8 = vadd.f32 %v1711_v56, %v417_v7  ;;  %v496_v9 = vpack.c.bf16 %v481_v4, %v480_v3  ;;  %v486_v21 = vmax.f32 %v426_v5, 0.0 }
 0x212   :  { %v1341_v11 = vpop.f32.mrf.mxu1 }
 0x213   :  { %468 = vst [vmem:[#allocation8 + $0x20] sm:$0xff] %v418_v8  ;;  %v429_v12 = vadd.f32 %v1341_v11, %v1711_v56  ;;  %1366 = vmatprep.mubr.bf16.mxu0 %v496_v9  ;;  %v484_v18 = vmax.f32 %v418_v8, 0.0 }
 0x214   :  { %v420_v13 = vpop.f32.mrf.mxu1  ;;  %1367 = vmatmul.mubr.bf16.vlgmr.msra.gmra.mxu0 %v497_v10 }
 0x215   :  { %471 = vst [vmem:[#allocation8 + $0x38] sm:$0xff] %v429_v12  ;;  %v421_v14 = vadd.f32 %v1711_v56, %v420_v13  ;;  %v487_v15 = vmax.f32 %v429_v12, 0.0  ;;  %1415 = vmatpush3.bf16.msra.mxu0 %v1519_v58 }
 0x216   :  { %v1344_v17 = vpop.f32.mrf.mxu1  ;;  %1416 = vmatprep.subr.bf16.mxu0 %v1520_v59 }
 0x217   :  { %469 = vst [vmem:[#allocation8 + $0x28] sm:$0xff] %v421_v14  ;;  %v485_v19 = vmax.f32 %v421_v14, 0.0  ;;  %v442_v20 = vadd.f32 %v1344_v17, %v1711_v56  ;;  %v499_v26 = vpack.c.bf16 %v487_v15, %v486_v21 }
 0x218   :  { %v433_v22 = vpop.f32.mrf.mxu1 }
 0x219   :  { %474 = vst [vmem:[#allocation8 + $0x50] sm:$0xff] %v442_v20  ;;  %v434_v23 = vadd.f32 %v1711_v56, %v433_v22  ;;  %v498_v24 = vpack.c.bf16 %v485_v19, %v484_v18  ;;  %v490_v35 = vmax.f32 %v442_v20, 0.0  ;;  %1417 = vmatpush3.bf16.msra.mxu0 %v1520_v59 }
 0x21a   :  { %v1345_v25 = vpop.f32.mrf.mxu1  ;;  %1418 = vmatprep.subr.bf16.mxu0 %v1521_v60 }
 0x21b   :  { %472 = vst [vmem:[#allocation8 + $0x40] sm:$0xff] %v434_v23  ;;  %v445_v27 = vadd.f32 %v1345_v25, %v1711_v56  ;;  %1370 = vmatprep.mubr.bf16.mxu0 %v498_v24  ;;  %v488_v32 = vmax.f32 %v434_v23, 0.0  ;;  %v1524_v23 = vld [vmem:[#allocation7 + $0x90] sm:$0xff]   ;;  %v1525_v24 = vld [vmem:[#allocation7 + $0x88] sm:$0xff]   ;;  %v1526_v25 = vld [vmem:[#allocation7 + $0x80] sm:$0xff]  }
 0x21c   :  { %v436_v28 = vpop.f32.mrf.mxu1  ;;  %1371 = vmatmul.mubr.bf16.gmra.mxu0 %v499_v26  ;;  %v1740_v26 = vld [vmem:[%s1783_s3 + $0x1] ss:$0 sm:$0xff] }
 0x21d   :  { %475 = vst [vmem:[#allocation8 + $0x58] sm:$0xff] %v445_v27  ;;  %v437_v29 = vadd.f32 %v1711_v56, %v436_v28  ;;  %v491_v30 = vmax.f32 %v445_v27, 0.0  ;;  %1419 = vmatpush3.bf16.msra.mxu0 %v1521_v60 }
 0x21e   :  { %v1348_v31 = vpop.f32.mrf.mxu1  ;;  %1420 = vmatprep.subr.bf16.mxu0 %v1522_v61 }
 0x21f   :  { %473 = vst [vmem:[#allocation8 + $0x48] sm:$0xff] %v437_v29  ;;  %v489_v33 = vmax.f32 %v437_v29, 0.0  ;;  %v458_v34 = vadd.f32 %v1348_v31, %v1711_v56  ;;  %v501_v40 = vpack.c.bf16 %v491_v30, %v490_v35 }
 0x220   :  { %v449_v36 = vpop.f32.mrf.mxu1 }
 0x221   :  { %478 = vst [vmem:[#allocation8 + $0x70] sm:$0xff] %v458_v34  ;;  %v450_v37 = vadd.f32 %v1711_v56, %v449_v36  ;;  %v500_v38 = vpack.c.bf16 %v489_v33, %v488_v32  ;;  %v494_v54 = vmax.f32 %v458_v34, 0.0  ;;  %1421 = vmatpush3.bf16.msra.mxu0 %v1522_v61 }
 0x222   :  { %v1349_v39 = vpop.f32.mrf.mxu1 }
 0x223   :  { %476 = vst [vmem:[#allocation8 + $0x60] sm:$0xff] %v450_v37  ;;  %v461_v41 = vadd.f32 %v1349_v39, %v1711_v56  ;;  %1374 = vmatprep.mubr.bf16.mxu0 %v500_v38  ;;  %v492_v45 = vmax.f32 %v450_v37, 0.0 }
 0x224   :  { %v452_v42 = vpop.f32.mrf.mxu1  ;;  %1375 = vmatmul.mubr.bf16.gmra.mxu0 %v501_v40 }
 0x225   :  { %479 = vst [vmem:[#allocation8 + $0x78] sm:$0xff] %v461_v41  ;;  %v453_v43 = vadd.f32 %v1711_v56, %v452_v42  ;;  %v495_v44 = vmax.f32 %v461_v41, 0.0  ;;  %v1523_v56 = vld [vmem:[#allocation7 + $0x98] sm:$0xff]  }
 0x226   :  { %1422 = vmatprep.subr.bf16.mxu0 %v1523_v56 }
 0x227   :  { %477 = vst [vmem:[#allocation8 + $0x68] sm:$0xff] %v453_v43  ;;  %v493_v53 = vmax.f32 %v453_v43, 0.0  ;;  %v503_v57 = vpack.c.bf16 %v495_v44, %v494_v54  ;;  %1423 = vmatpush3.bf16.msra.mxu0 %v1523_v56 }
 0x228   :  { %1424 = vmatprep.subr.bf16.mxu0 %v1524_v23 }
 0x229   :  { %v502_v55 = vpack.c.bf16 %v493_v53, %v492_v45 }
 0x22b   :  { %1378 = vmatprep.mubr.bf16.mxu0 %v502_v55  ;;  %1425 = vmatpush3.bf16.msra.mxu0 %v1524_v23 }
 0x22c   :  { %1379 = vmatmul.mubr.bf16.gmra.mxu0 %v503_v57  ;;  %1426 = vmatprep.subr.bf16.mxu0 %v1525_v24 }
 0x22f   :  { %1427 = vmatpush3.bf16.msra.mxu0 %v1525_v24 }
 0x230   :  { %1428 = vmatprep.subr.bf16.mxu0 %v1526_v25 }
 0x233   :  { %1429 = vmatpush3.bf16.msra.mxu0 %v1526_v25 }
 0x2d4   :  { %v1368_v62 = vpop.f32.mrf.mxu0 }
 0x2d6   :  { %v603_v63 = vpop.f32.mrf.mxu0 }
 0x2d8   :  { %v1369_v0 = vpop.f32.mrf.mxu0 }
 0x2d9   :  { %v667_v21 = vpack.c.bf16 %v1369_v0, %v1368_v62 }
 0x2da   :  { %v606_v1 = vpop.f32.mrf.mxu0 }
 0x2db   :  { %v666_v22 = vpack.c.bf16 %v606_v1, %v603_v63 }
 0x2dc   :  { %v1372_v2 = vpop.f32.mrf.mxu0 }
 0x2de   :  { %v619_v3 = vpop.f32.mrf.mxu0 }
 0x2e0   :  { %v1373_v4 = vpop.f32.mrf.mxu0 }
 0x2e1   :  { %v669_v19 = vpack.c.bf16 %v1373_v4, %v1372_v2 }
 0x2e2   :  { %v622_v5 = vpop.f32.mrf.mxu0 }
 0x2e3   :  { %v668_v20 = vpack.c.bf16 %v622_v5, %v619_v3 }
 0x2e4   :  { %v1376_v6 = vpop.f32.mrf.mxu0 }
 0x2e6   :  { %v635_v7 = vpop.f32.mrf.mxu0 }
 0x2e8   :  { %v1377_v8 = vpop.f32.mrf.mxu0 }
 0x2e9   :  { %v671_v17 = vpack.c.bf16 %v1377_v8, %v1376_v6 }
 0x2ea   :  { %v638_v9 = vpop.f32.mrf.mxu0 }
 0x2eb   :  { %v670_v18 = vpack.c.bf16 %v638_v9, %v635_v7 }
 0x2ec   :  { %v1380_v10 = vpop.f32.mrf.mxu0 }
 0x2ee   :  { %v651_v11 = vpop.f32.mrf.mxu0 }
 0x2f0   :  { %v1381_v12 = vpop.f32.mrf.mxu0 }
 0x2f1   :  { %v673_v13 = vpack.c.bf16 %v1381_v12, %v1380_v10 }
 0x2f2   :  { %v654_v14 = vpop.f32.mrf.mxu0 }
 0x2f3   :  { %v672_v15 = vpack.c.bf16 %v654_v14, %v651_v11  ;;  %1382 = vmatprep.subr.bf16.mxu1 %v673_v13 }
 0x2f4   :  { %1383 = vmatpush3.bf16.msra.mxu1 %v673_v13 }
 0x2f5   :  { %1384 = vmatprep.subr.bf16.mxu1 %v672_v15 }
 0x2f8   :  { %1385 = vmatpush3.bf16.msra.mxu1 %v672_v15 }
 0x2f9   :  { %1386 = vmatprep.subr.bf16.mxu1 %v671_v17 }
 0x2fc   :  { %1387 = vmatpush3.bf16.msra.mxu1 %v671_v17 }
 0x2fd   :  { %1388 = vmatprep.subr.bf16.mxu1 %v670_v18 }
 0x300   :  { %1389 = vmatpush3.bf16.msra.mxu1 %v670_v18 }
 0x301   :  { %1390 = vmatprep.subr.bf16.mxu1 %v669_v19 }
 0x304   :  { %1391 = vmatpush3.bf16.msra.mxu1 %v669_v19 }
 0x305   :  { %1392 = vmatprep.subr.bf16.mxu1 %v668_v20 }
 0x308   :  { %1393 = vmatpush3.bf16.msra.mxu1 %v668_v20 }
 0x309   :  { %1394 = vmatprep.subr.bf16.mxu1 %v667_v21 }
 0x30c   :  { %1395 = vmatpush3.bf16.msra.mxu1 %v667_v21 }
 0x30d   :  { %1396 = vmatprep.subr.bf16.mxu1 %v666_v22 }
 0x310   :  { %1397 = vmatpush3.bf16.msra.mxu1 %v666_v22 }
 0x313   :  { %1399 = vmatmul.mubr.bf16.vlgmr.msra.gmra.mxu1 %v1686_v46 }
 0x314   :  { %1402 = vmatprep.mubr.bf16.mxu1 %v1688_v47 }
 0x31b   :  { %1403 = vmatmul.mubr.bf16.gmra.mxu1 %v1692_v48 }
 0x31c   :  { %1406 = vmatprep.mubr.bf16.mxu1 %v1694_v49 }
 0x323   :  { %1407 = vmatmul.mubr.bf16.gmra.mxu1 %v1698_v50 }
 0x324   :  { %1410 = vmatprep.mubr.bf16.mxu1 %v1700_v51 }
 0x32b   :  { %1411 = vmatmul.mubr.bf16.gmra.mxu1 %v1704_v52 }
 0x32c   :  { %1462 = vmatprep.mubr.bf16.mxu1 %v1683_v16 }
 0x3d3   :  { %v1400_v27 = vpop.f32.mrf.mxu1 }
 0x3d4   :  { %v725_v28 = vadd.f32 %v1400_v27, %v1740_v26 }
 0x3d5   :  { %v716_v29 = vpop.f32.mrf.mxu1 }
 0x3d6   :  { %782 = vst [vmem:[#allocation8 + $0x90] sm:$0xff] %v725_v28  ;;  %v717_v16 = vadd.f32 %v1740_v26, %v716_v29  ;;  %v798_v39 = vmax.f32 %v725_v28, 0.0 }
 0x3d7   :  { %v1401_v30 = vpop.f32.mrf.mxu1 }
 0x3d8   :  { %780 = vst [vmem:[#allocation8 + $0x80] sm:$0xff] %v717_v16  ;;  %v728_v31 = vadd.f32 %v1401_v30, %v1740_v26  ;;  %v796_v36 = vmax.f32 %v717_v16, 0.0 }
 0x3d9   :  { %v719_v32 = vpop.f32.mrf.mxu1 }
 0x3da   :  { %783 = vst [vmem:[#allocation8 + $0x98] sm:$0xff] %v728_v31  ;;  %v720_v33 = vadd.f32 %v1740_v26, %v719_v32  ;;  %v799_v34 = vmax.f32 %v728_v31, 0.0 }
 0x3db   :  { %v1404_v35 = vpop.f32.mrf.mxu1 }
 0x3dc   :  { %781 = vst [vmem:[#allocation8 + $0x88] sm:$0xff] %v720_v33  ;;  %v797_v37 = vmax.f32 %v720_v33, 0.0  ;;  %v741_v38 = vadd.f32 %v1404_v35, %v1740_v26  ;;  %v813_v43 = vpack.c.bf16 %v799_v34, %v798_v39 }
 0x3dd   :  { %v732_v40 = vpop.f32.mrf.mxu1 }
 0x3de   :  { %786 = vst [vmem:[#allocation8 + $0xb0] sm:$0xff] %v741_v38  ;;  %v733_v41 = vadd.f32 %v1740_v26, %v732_v40  ;;  %v812_v42 = vpack.c.bf16 %v797_v37, %v796_v36  ;;  %v802_v61 = vmax.f32 %v741_v38, 0.0 }
 0x3df   :  { %v1405_v44 = vpop.f32.mrf.mxu1 }
 0x3e0   :  { %784 = vst [vmem:[#allocation8 + $0xa0] sm:$0xff] %v733_v41  ;;  %v744_v45 = vadd.f32 %v1405_v44, %v1740_v26  ;;  %1430 = vmatprep.mubr.bf16.mxu0 %v812_v42  ;;  %v800_v58 = vmax.f32 %v733_v41, 0.0 }
 0x3e1   :  { %v735_v53 = vpop.f32.mrf.mxu1  ;;  %1431 = vmatmul.mubr.bf16.vlgmr.msra.gmra.mxu0 %v813_v43 }
 0x3e2   :  { %787 = vst [vmem:[#allocation8 + $0xb8] sm:$0xff] %v744_v45  ;;  %v736_v54 = vadd.f32 %v1740_v26, %v735_v53  ;;  %v803_v55 = vmax.f32 %v744_v45, 0.0 }
 0x3e3   :  { %v1408_v57 = vpop.f32.mrf.mxu1 }
 0x3e4   :  { %785 = vst [vmem:[#allocation8 + $0xa8] sm:$0xff] %v736_v54  ;;  %v801_v59 = vmax.f32 %v736_v54, 0.0  ;;  %v757_v60 = vadd.f32 %v1408_v57, %v1740_v26  ;;  %v815_v1 = vpack.c.bf16 %v803_v55, %v802_v61 }
 0x3e5   :  { %v748_v56 = vpop.f32.mrf.mxu1 }
 0x3e6   :  { %790 = vst [vmem:[#allocation8 + $0xd0] sm:$0xff] %v757_v60  ;;  %v749_v62 = vadd.f32 %v1740_v26, %v748_v56  ;;  %v814_v63 = vpack.c.bf16 %v801_v59, %v800_v58  ;;  %v806_v10 = vmax.f32 %v757_v60, 0.0 }
 0x3e7   :  { %v1409_v0 = vpop.f32.mrf.mxu1 }
 0x3e8   :  { %788 = vst [vmem:[#allocation8 + $0xc0] sm:$0xff] %v749_v62  ;;  %v760_v2 = vadd.f32 %v1409_v0, %v1740_v26  ;;  %1434 = vmatprep.mubr.bf16.mxu0 %v814_v63  ;;  %v804_v7 = vmax.f32 %v749_v62, 0.0 }
 0x3e9   :  { %v751_v3 = vpop.f32.mrf.mxu1  ;;  %1435 = vmatmul.mubr.bf16.gmra.mxu0 %v815_v1 }
 0x3ea   :  { %791 = vst [vmem:[#allocation8 + $0xd8] sm:$0xff] %v760_v2  ;;  %v752_v4 = vadd.f32 %v1740_v26, %v751_v3  ;;  %v807_v5 = vmax.f32 %v760_v2, 0.0 }
 0x3eb   :  { %v1412_v6 = vpop.f32.mrf.mxu1 }
 0x3ec   :  { %789 = vst [vmem:[#allocation8 + $0xc8] sm:$0xff] %v752_v4  ;;  %v805_v8 = vmax.f32 %v752_v4, 0.0  ;;  %v773_v9 = vadd.f32 %v1412_v6, %v1740_v26  ;;  %v817_v15 = vpack.c.bf16 %v807_v5, %v806_v10 }
 0x3ed   :  { %v764_v11 = vpop.f32.mrf.mxu1 }
 0x3ee   :  { %794 = vst [vmem:[#allocation8 + $0xf0] sm:$0xff] %v773_v9  ;;  %v765_v12 = vadd.f32 %v1740_v26, %v764_v11  ;;  %v816_v13 = vpack.c.bf16 %v805_v8, %v804_v7  ;;  %v810_v23 = vmax.f32 %v773_v9, 0.0 }
 0x3ef   :  { %v1413_v14 = vpop.f32.mrf.mxu1 }
 0x3f0   :  { %792 = vst [vmem:[#allocation8 + $0xe0] sm:$0xff] %v765_v12  ;;  %v776_v17 = vadd.f32 %v1413_v14, %v1740_v26  ;;  %1438 = vmatprep.mubr.bf16.mxu0 %v816_v13  ;;  %v808_v21 = vmax.f32 %v765_v12, 0.0 }
 0x3f1   :  { %v767_v18 = vpop.f32.mrf.mxu1  ;;  %1439 = vmatmul.mubr.bf16.gmra.mxu0 %v817_v15 }
 0x3f2   :  { %795 = vst [vmem:[#allocation8 + $0xf8] sm:$0xff] %v776_v17  ;;  %v768_v19 = vadd.f32 %v1740_v26, %v767_v18  ;;  %v811_v20 = vmax.f32 %v776_v17, 0.0 }
 0x3f4   :  { %793 = vst [vmem:[#allocation8 + $0xe8] sm:$0xff] %v768_v19  ;;  %v809_v22 = vmax.f32 %v768_v19, 0.0  ;;  %v819_v25 = vpack.c.bf16 %v811_v20, %v810_v23 }
 0x3f6   :  { %v818_v24 = vpack.c.bf16 %v809_v22, %v808_v21 }
 0x3f8   :  { %1442 = vmatprep.mubr.bf16.mxu0 %v818_v24 }
 0x3f9   :  { %1443 = vmatmul.mubr.bf16.gmra.mxu0 %v819_v25 }
 0x4a1   :  { %v1432_v27 = vpop.f32.mrf.mxu0 }
 0x4a3   :  { %v919_v28 = vpop.f32.mrf.mxu0 }
 0x4a5   :  { %v1433_v29 = vpop.f32.mrf.mxu0 }
 0x4a6   :  { %v983_v54 = vpack.c.bf16 %v1433_v29, %v1432_v27 }
 0x4a7   :  { %v922_v16 = vpop.f32.mrf.mxu0 }
 0x4a8   :  { %v982_v55 = vpack.c.bf16 %v922_v16, %v919_v28 }
 0x4a9   :  { %v1436_v30 = vpop.f32.mrf.mxu0 }
 0x4ab   :  { %v935_v31 = vpop.f32.mrf.mxu0 }
 0x4ad   :  { %v1437_v32 = vpop.f32.mrf.mxu0 }
 0x4ae   :  { %v985_v45 = vpack.c.bf16 %v1437_v32, %v1436_v30 }
 0x4af   :  { %v938_v33 = vpop.f32.mrf.mxu0 }
 0x4b0   :  { %v984_v53 = vpack.c.bf16 %v938_v33, %v935_v31 }
 0x4b1   :  { %v1440_v34 = vpop.f32.mrf.mxu0 }
 0x4b3   :  { %v951_v35 = vpop.f32.mrf.mxu0 }
 0x4b5   :  { %v1441_v26 = vpop.f32.mrf.mxu0 }
 0x4b6   :  { %v987_v43 = vpack.c.bf16 %v1441_v26, %v1440_v34 }
 0x4b7   :  { %v954_v36 = vpop.f32.mrf.mxu0 }
 0x4b8   :  { %v986_v44 = vpack.c.bf16 %v954_v36, %v951_v35 }
 0x4b9   :  { %v1444_v37 = vpop.f32.mrf.mxu0 }
 0x4bb   :  { %v967_v38 = vpop.f32.mrf.mxu0 }
 0x4bd   :  { %v1445_v39 = vpop.f32.mrf.mxu0 }
 0x4be   :  { %v989_v40 = vpack.c.bf16 %v1445_v39, %v1444_v37 }
 0x4bf   :  { %v970_v41 = vpop.f32.mrf.mxu0 }
 0x4c0   :  { %v988_v42 = vpack.c.bf16 %v970_v41, %v967_v38  ;;  %1446 = vmatprep.subr.bf16.mxu1 %v989_v40 }
 0x4c1   :  { %1447 = vmatpush3.bf16.msra.mxu1 %v989_v40 }
 0x4c2   :  { %1448 = vmatprep.subr.bf16.mxu1 %v988_v42 }
 0x4c5   :  { %1449 = vmatpush3.bf16.msra.mxu1 %v988_v42 }
 0x4c6   :  { %1450 = vmatprep.subr.bf16.mxu1 %v987_v43 }
 0x4c9   :  { %1451 = vmatpush3.bf16.msra.mxu1 %v987_v43 }
 0x4ca   :  { %1452 = vmatprep.subr.bf16.mxu1 %v986_v44 }
 0x4cd   :  { %1453 = vmatpush3.bf16.msra.mxu1 %v986_v44 }
 0x4ce   :  { %1454 = vmatprep.subr.bf16.mxu1 %v985_v45 }
 0x4d1   :  { %1455 = vmatpush3.bf16.msra.mxu1 %v985_v45 }
 0x4d2   :  { %1456 = vmatprep.subr.bf16.mxu1 %v984_v53 }
 0x4d5   :  { %1457 = vmatpush3.bf16.msra.mxu1 %v984_v53 }
 0x4d6   :  { %1458 = vmatprep.subr.bf16.mxu1 %v983_v54 }
 0x4d9   :  { %1459 = vmatpush3.bf16.msra.mxu1 %v983_v54 }
 0x4da   :  { %1460 = vmatprep.subr.bf16.mxu1 %v982_v55 }
 0x4dd   :  { %1461 = vmatpush3.bf16.msra.mxu1 %v982_v55 }
 0x4e0   :  { %1463 = vmatmul.mubr.bf16.vlgmr.msra.gmra.mxu1 %v1686_v46 }
 0x4e1   :  { %1466 = vmatprep.mubr.bf16.mxu1 %v1688_v47 }
 0x4e8   :  { %1467 = vmatmul.mubr.bf16.gmra.mxu1 %v1692_v48 }
 0x4e9   :  { %1470 = vmatprep.mubr.bf16.mxu1 %v1694_v49 }
 0x4f0   :  { %1471 = vmatmul.mubr.bf16.gmra.mxu1 %v1698_v50 }
 0x4f1   :  { %1474 = vmatprep.mubr.bf16.mxu1 %v1700_v51 }
 0x4f8   :  { %1475 = vmatmul.mubr.bf16.gmra.mxu1 %v1704_v52 }
 0x4f9   :  { %1598 = shalt.err (!%p1595_p5)
}
 0x4fa   :  { %s1641_s14 = smov 128   ;;  %s1642_s15 = smov 8   ;;  %v1189_v46 = vld [vmem:[%s1783_s3 + $0x2] ss:$0 sm:$0xff] }
 0x4fb   :  { %1122 = dma.vmem_to_hbm [thread:$0]  %s1117_s12, 4096, %s1784_s4, [#allocation4], %s1641_s14, %s1641_s14, %s1642_s15  }
 0x4fc   :  { %s1643_s3 = smov [#allocation9]  }
 0x4fd   :  { %s1128_s4 = sshll.u32 %s1643_s3, 4  ;;  %s1129_s4 = int_to_ptr.vmem [resolvable:$true] %s1128_s4 }
 0x4fe   :  { %s1607_s20 = scalar_lea.vmem %s1129_s4, 2048  ;;  %p1612_p7 = scmp.lt.s32.totalorder %s1129_s4, %s1129_s4 }
 0x4ff   :  { %p1608_p6 = scmp.ne.s32.totalorder %s1129_s4, %s1607_s20  ;;  %p1613_p8 = scmp.lt.s32.totalorder %s1607_s20, %s1607_s20 }
 0x501   :  { %p1614_p9 = por %p1613_p8, %p1612_p7 }
 0x503   :  { %p1615_p10 = pnand %p1614_p9, %p1608_p6 }
 0x5a0   :  { %v1464_v47 = vpop.f32.mrf.mxu1 }
 0x5a1   :  { %v1041_v48 = vadd.f32 %v1464_v47, %v1189_v46 }
 0x5a2   :  { %v1032_v49 = vpop.f32.mrf.mxu1 }
 0x5a3   :  { %1097 = vst [vmem:[#allocation9 + $0x10] sm:$0xff] %v1041_v48  ;;  %v1033_v50 = vadd.f32 %v1189_v46, %v1032_v49 }
 0x5a4   :  { %v1465_v51 = vpop.f32.mrf.mxu1 }
 0x5a5   :  { %1095 = vst [vmem:[#allocation9] sm:$0xff] %v1033_v50  ;;  %v1044_v52 = vadd.f32 %v1465_v51, %v1189_v46 }
 0x5a6   :  { %v1035_v57 = vpop.f32.mrf.mxu1 }
 0x5a7   :  { %1098 = vst [vmem:[#allocation9 + $0x18] sm:$0xff] %v1044_v52  ;;  %v1036_v58 = vadd.f32 %v1189_v46, %v1035_v57 }
 0x5a8   :  { %v1468_v59 = vpop.f32.mrf.mxu1 }
 0x5a9   :  { %1096 = vst [vmem:[#allocation9 + $0x8] sm:$0xff] %v1036_v58  ;;  %v1057_v60 = vadd.f32 %v1468_v59, %v1189_v46 }
 0x5aa   :  { %v1048_v61 = vpop.f32.mrf.mxu1 }
 0x5ab   :  { %1101 = vst [vmem:[#allocation9 + $0x30] sm:$0xff] %v1057_v60  ;;  %v1049_v56 = vadd.f32 %v1189_v46, %v1048_v61 }
 0x5ac   :  { %v1469_v62 = vpop.f32.mrf.mxu1 }
 0x5ad   :  { %1099 = vst [vmem:[#allocation9 + $0x20] sm:$0xff] %v1049_v56  ;;  %v1060_v63 = vadd.f32 %v1469_v62, %v1189_v46 }
 0x5ae   :  { %v1051_v0 = vpop.f32.mrf.mxu1 }
 0x5af   :  { %1102 = vst [vmem:[#allocation9 + $0x38] sm:$0xff] %v1060_v63  ;;  %v1052_v1 = vadd.f32 %v1189_v46, %v1051_v0 }
 0x5b0   :  { %v1472_v2 = vpop.f32.mrf.mxu1 }
 0x5b1   :  { %1100 = vst [vmem:[#allocation9 + $0x28] sm:$0xff] %v1052_v1  ;;  %v1073_v3 = vadd.f32 %v1472_v2, %v1189_v46 }
 0x5b2   :  { %v1064_v4 = vpop.f32.mrf.mxu1 }
 0x5b3   :  { %1105 = vst [vmem:[#allocation9 + $0x50] sm:$0xff] %v1073_v3  ;;  %v1065_v5 = vadd.f32 %v1189_v46, %v1064_v4 }
 0x5b4   :  { %v1473_v6 = vpop.f32.mrf.mxu1 }
 0x5b5   :  { %1103 = vst [vmem:[#allocation9 + $0x40] sm:$0xff] %v1065_v5  ;;  %v1076_v7 = vadd.f32 %v1473_v6, %v1189_v46 }
 0x5b6   :  { %v1067_v8 = vpop.f32.mrf.mxu1 }
 0x5b7   :  { %1106 = vst [vmem:[#allocation9 + $0x58] sm:$0xff] %v1076_v7  ;;  %v1068_v9 = vadd.f32 %v1189_v46, %v1067_v8 }
 0x5b8   :  { %v1476_v10 = vpop.f32.mrf.mxu1 }
 0x5b9   :  { %1104 = vst [vmem:[#allocation9 + $0x48] sm:$0xff] %v1068_v9  ;;  %v1089_v11 = vadd.f32 %v1476_v10, %v1189_v46 }
 0x5ba   :  { %v1080_v12 = vpop.f32.mrf.mxu1 }
 0x5bb   :  { %1109 = vst [vmem:[#allocation9 + $0x70] sm:$0xff] %v1089_v11  ;;  %v1081_v13 = vadd.f32 %v1189_v46, %v1080_v12 }
 0x5bc   :  { %v1477_v14 = vpop.f32.mrf.mxu1 }
 0x5bd   :  { %1107 = vst [vmem:[#allocation9 + $0x60] sm:$0xff] %v1081_v13  ;;  %v1092_v15 = vadd.f32 %v1477_v14, %v1189_v46 }
 0x5be   :  { %v1083_v17 = vpop.f32.mrf.mxu1 }
 0x5bf   :  { %1110 = vst [vmem:[#allocation9 + $0x78] sm:$0xff] %v1092_v15  ;;  %v1084_v18 = vadd.f32 %v1189_v46, %v1083_v17 }
 0x5c1   :  { %1108 = vst [vmem:[#allocation9 + $0x68] sm:$0xff] %v1084_v18 }
 0x5c2   :  { %1618 = shalt.err (!%p1615_p10)
}
 0x5c3   :  { %1134 = dma.vmem_to_hbm [thread:$0]  %s1129_s4, 2048, %s1785_s5, [#allocation10], %s1641_s14, %s1641_s14, %s1642_s15  }
 0x5c4   :  { %1631 = dma.done.wait [#allocation4], 4096  }
 0x5c5   :  { %1632 = vsyncadd [#allocation4], 4294963200 }
 0x5c6   :  { %1633 = dma.done.wait [#allocation10], 2048  }
 0x5c7   :  { %1634 = vsyncadd [#allocation10], 4294965248 }
 0x5c8   :  { %1141 = vsyncpa [#allocation3], 1 }
 0x5c9   :  { %1142 = vsyncpa [#allocation6], 1 }
 0x5ca   :  { %1143 = vsyncpa [#allocation4], 1 }
 0x5cb   :  { %1144 = vsyncpa [#allocation10], 1 }

</bundles_post_ra>
